<compile_context>
chip_gen: v7x
topology: tpu7x:2x2x1
jax: 0.10.0
libtpu: 0.0.40
codegen_flags: <defaults>
</compile_context>

<pallas_src>
import math
import functools

import jax
import jax.numpy as jnp
from jax import lax
from jax.experimental import pallas as pl
from jax.experimental.pallas import tpu as pltpu

_MASK_VALUE = -1e30              # large finite negative (no -inf in online softmax)
_LOG2E = math.log2(math.e)       # exp(x) == exp2(x * log2(e))


def _vmem_limit_bytes():
    """Scoped-VMEM budget from the actual chip, leaving compiler headroom."""
    cap = 128 * 1024 * 1024
    try:
        info = pltpu.get_tpu_info()
        cap = int(getattr(info, "vmem_capacity_bytes", cap))
    except Exception:
        pass
    # v7x (64 MiB/TC) -> 48 MiB; v5e/v6e (128 MiB) -> 110 MiB.
    return max(32 * 1024 * 1024, min(cap - 16 * 1024 * 1024, 110 * 1024 * 1024))


def _sublane_multiple(dtype):
    """Minimal legal second-minor tile multiple: f32->8, bf16->16, int8/fp8->32."""
    itemsize = jnp.dtype(dtype).itemsize
    return max(8, 32 // max(1, itemsize))


def _pick_tile(n, preferred, multiple):
    """Largest t <= preferred with n % t == 0 and t % multiple == 0, else full n."""
    if n <= preferred:
        return n
    start = preferred - (preferred % multiple)
    for t in range(start, multiple - 1, -multiple):
        if n % t == 0:
            return t
    return n  # full extent is always a legal block shape


# ----------------------------------------------------------------------------
# Kernel 1: fused Q/K/V projection  (one [H, 3H] matmul per (batch, T-tile))
# ----------------------------------------------------------------------------
def _qkv_proj_kernel(x_ref, w_ref, b_ref, q_ref, k_ref, v_ref, *, hidden):
    x = x_ref[0]                                                     # (tq, H)
    y = jnp.dot(x, w_ref[...], preferred_element_type=jnp.float32)   # (tq, 3H)
    y = y + b_ref[...]                                               # + (1, 3H)
    q_ref[0] = y[:, :hidden].astype(q_ref.dtype)
    k_ref[0] = y[:, hidden:2 * hidden].astype(k_ref.dtype)
    v_ref[0] = y[:, 2 * hidden:].astype(v_ref.dtype)


def qkv_projection(x, w_qkv, b_qkv, *, tq=256):
    B, T, H = x.shape
    tq = _pick_tile(T, tq, _sublane_multiple(x.dtype))
    grid = (B, T // tq)

    x_spec = pl.BlockSpec((1, tq, H), lambda b, i: (b, i, 0))
    w_spec = pl.BlockSpec((H, 3 * H), lambda b, i: (0, 0))
    b_spec = pl.BlockSpec((1, 3 * H), lambda b, i: (0, 0))
    o_spec = pl.BlockSpec((1, tq, H), lambda b, i: (b, i, 0))
    out_shape = jax.ShapeDtypeStruct((B, T, H), x.dtype)

    return pl.pallas_call(
        functools.partial(_qkv_proj_kernel, hidden=H),
        out_shape=(out_shape, out_shape, out_shape),
        grid_spec=pltpu.PrefetchScalarGridSpec(
            num_scalar_prefetch=0,
            grid=grid,
            in_specs=[x_spec, w_spec, b_spec],
            out_specs=[o_spec, o_spec, o_spec],
        ),
        compiler_params=pltpu.CompilerParams(
            dimension_semantics=("parallel", "parallel"),
            vmem_limit_bytes=_vmem_limit_bytes()),
    )(x, w_qkv, b_qkv)


# ----------------------------------------------------------------------------
# Kernel 2: flash-style causal attention, all heads per (batch, q-tile) step
# ----------------------------------------------------------------------------
def _flash_attn_kernel(q_ref, k_ref, v_ref, mask_ref, o_ref,
                       m_ref, l_ref, acc_ref, *, num_heads, head_dim):
    tq = q_ref.shape[1]
    tk = k_ref.shape[1]
    qi = pl.program_id(1)
    ki = pl.program_id(2)

    @pl.when(ki == 0)
    def _init():
        m_ref[...] = jnp.full(m_ref.shape, _MASK_VALUE, m_ref.dtype)
        l_ref[...] = jnp.zeros(l_ref.shape, l_ref.dtype)
        acc_ref[...] = jnp.zeros(acc_ref.shape, acc_ref.dtype)

    q_start = qi * tq
    kv_start = ki * tk

    # Causal structure: KV blocks entirely above the diagonal contribute nothing
    # (their DMA is also skipped via the clamped index_map in the wrapper).
    @pl.when(kv_start <= q_start + (tq - 1))
    def _compute():
        # 1/sqrt(d) and log2(e) are already folded into Wq/bq -> no rescale here.
        q_all = q_ref[0]                               # (tq, H)
        k_all = k_ref[0]                               # (tk, H)
        v_all = v_ref[0]                               # (tk, H)

        # One shared additive bias per grid step (base-2 domain): padding mask
        # where visible, large negative where causally masked.
        am2 = mask_ref[0, 0].astype(jnp.float32) * _LOG2E            # (1, tk)
        row = q_start + lax.broadcasted_iota(jnp.int32, (tq, tk), 0)
        col = kv_start + lax.broadcasted_iota(jnp.int32, (tq, tk), 1)
        bias = jnp.where(col > row, _MASK_VALUE, am2)                 # (tq, tk)

        dnum = (((1,), (1,)), ((), ()))   # contract last dims of both (no .T)

        for h in range(num_heads):        # static unroll (small num_heads)
            sl = slice(h * head_dim, (h + 1) * head_dim)
            qh = q_all[:, sl]                          # (tq, d)
            kh = k_all[:, sl]                          # (tk, d)
            vh = v_all[:, sl]                          # (tk, d)

            s = lax.dot_general(qh, kh, dnum,
                                preferred_element_type=jnp.float32)   # (tq, tk)
            s = s + bias

            m_prev = m_ref[h]                          # (tq, 1)
            m_new = jnp.maximum(m_prev, jnp.max(s, axis=-1, keepdims=True))
            alpha = jnp.exp2(m_prev - m_new)           # exp2 trick (EUP relief)
            p = jnp.exp2(s - m_new)
            l_ref[h] = alpha * l_ref[h] + jnp.sum(p, axis=-1, keepdims=True)
            acc_ref[h] = alpha * acc_ref[h] + jnp.dot(
                p.astype(vh.dtype), vh, preferred_element_type=jnp.float32)
            m_ref[h] = m_new

    @pl.when(ki == pl.num_programs(2) - 1)
    def _finalize():
        d = head_dim
        # Normalize and store per 128-lane head group: no (tq, H) concatenate
        # held in registers, lane-aligned stores where possible.
        if d < 128 and 128 % d == 0:
            heads_per_group = 128 // d
        else:
            heads_per_group = 1
        for g0 in range(0, num_heads, heads_per_group):
            g1 = min(g0 + heads_per_group, num_heads)
            outs = []
            for h in range(g0, g1):
                l = l_ref[h]
                inv = pl.reciprocal(l, approx=True)
                inv = inv * (2.0 - l * inv)            # one Newton step -> ~f32 exact
                outs.append(acc_ref[h] * inv)
            blk = outs[0] if len(outs) == 1 else jnp.concatenate(outs, axis=-1)
            o_ref[0, :, g0 * d:g1 * d] = blk.astype(o_ref.dtype)


def flash_causal_attention(q, k, v, attention_mask, num_heads, *, tq=256, tk=512):
    B, T, H = q.shape
    d = H // num_heads
    tq = _pick_tile(T, tq, _sublane_multiple(q.dtype))
    # KV tile must be a multiple of 128 (mask last-dim block constraint) or full T.
    tk = _pick_tile(T, tk, 128)
    grid = (B, T // tq, T // tk)

    # Clamp the KV / mask block index at the causal boundary: for KV blocks
    # entirely above the diagonal the index repeats, so Pallas skips the DMA.
    def kv_index(b, i, j):
        return (b, jnp.minimum(j, ((i + 1) * tq - 1) // tk), 0)

    def mask_index(b, i, j):
        return (b, 0, 0, jnp.minimum(j, ((i + 1) * tq - 1) // tk))

    q_spec = pl.BlockSpec((1, tq, H), lambda b, i, j: (b, i, 0))
    kv_spec = pl.BlockSpec((1, tk, H), kv_index)
    mask_spec = pl.BlockSpec((1, 1, 1, tk), mask_index)
    out_spec = pl.BlockSpec((1, tq, H), lambda b, i, j: (b, i, 0))

    kernel = functools.partial(_flash_attn_kernel,
                               num_heads=num_heads, head_dim=d)
    return pl.pallas_call(
        kernel,
        out_shape=jax.ShapeDtypeStruct((B, T, H), q.dtype),
        grid_spec=pltpu.PrefetchScalarGridSpec(
            num_scalar_prefetch=0,
            grid=grid,
            in_specs=[q_spec, kv_spec, kv_spec, mask_spec],
            out_specs=out_spec,
            scratch_shapes=[
                pltpu.VMEM((num_heads, tq, 1), jnp.float32),   # running max  m
                pltpu.VMEM((num_heads, tq, 1), jnp.float32),   # running sum  l
                pltpu.VMEM((num_heads, tq, d), jnp.float32),   # output accumulator
            ],
        ),
        compiler_params=pltpu.CompilerParams(
            dimension_semantics=("parallel", "parallel", "arbitrary"),
            vmem_limit_bytes=_vmem_limit_bytes()),
    )(q, k, v, attention_mask)


# ----------------------------------------------------------------------------
# Module wrapper
# ----------------------------------------------------------------------------
def causal_self_attention(hidden_states, attention_mask, params, num_heads):
    B, T, H = hidden_states.shape
    d = H // num_heads
    # Fold 1/sqrt(d) and log2(e) (exp2 softmax) into the Q projection, and fuse
    # the three projections into one [H, 3H] weight / [1, 3H] bias.
    # (Parameter prep only; no per-token XLA passes.)
    q_scale = _LOG2E / math.sqrt(d)
    w_qkv = jnp.concatenate(
        [params["wq"] * q_scale, params["wk"], params["wv"]], axis=1)
    b_qkv = jnp.concatenate(
        [params["bq"] * q_scale, params["bk"], params["bv"]]).reshape(1, 3 * H)
    q, k, v = qkv_projection(hidden_states, w_qkv, b_qkv)
    # Q/K/V stay in [B, T, H]; head split/merge happens inside the kernel.
    return flash_causal_attention(q, k, v, attention_mask, num_heads)


# ----------------------------------------------------------------------------
# Pure-JAX reference for correctness check
# ----------------------------------------------------------------------------
def reference(hidden_states, attention_mask, params, num_heads):
    B, T, H = hidden_states.shape
    d = H // num_heads

    def proj(w, b):
        return hidden_states @ w + b

    def split(x):
        return x.reshape(B, T, num_heads, d).transpose(0, 2, 1, 3)

    q = split(proj(params["wq"], params["bq"]))
    k = split(proj(params["wk"], params["bk"]))
    v = split(proj(params["wv"], params["bv"]))

    scores = jnp.einsum("bhtd,bhsd->bhts", q, k) / math.sqrt(d)
    scores = scores + attention_mask
    causal = jnp.triu(jnp.ones((T, T), bool), k=1)
    scores = jnp.where(causal, -jnp.inf, scores)
    probs = jax.nn.softmax(scores, axis=-1)
    out = jnp.einsum("bhts,bhsd->bhtd", probs, v)
    return out.transpose(0, 2, 1, 3).reshape(B, T, H)


if __name__ == "__main__":
    # Small config: batch=2, seq=8, hidden=32, heads=4 (head_dim=8)
    B, T, H, NH = 2, 8, 32, 4

    key = jax.random.PRNGKey(0)
    ks = jax.random.split(key, 8)
    scale = 1.0 / math.sqrt(H)
    params = {
        "wq": jax.random.normal(ks[0], (H, H), jnp.float32) * scale,
        "wk": jax.random.normal(ks[1], (H, H), jnp.float32) * scale,
        "wv": jax.random.normal(ks[2], (H, H), jnp.float32) * scale,
        "bq": jax.random.normal(ks[3], (H,), jnp.float32) * 0.1,
        "bk": jax.random.normal(ks[4], (H,), jnp.float32) * 0.1,
        "bv": jax.random.normal(ks[5], (H,), jnp.float32) * 0.1,
    }
    hidden_states = jax.random.normal(ks[6], (B, T, H), jnp.float32)
    # additive attention mask, [B, 1, 1, T]: 0 for attend, -1e4 for padded positions
    pad = (jax.random.uniform(ks[7], (B, 1, 1, T)) < 0.2).astype(jnp.float32)
    attention_mask = pad * -1e4

    out = causal_self_attention(hidden_states, attention_mask, params, NH)
    out = jax.block_until_ready(out)

    ref = reference(hidden_states, attention_mask, params, NH)
    assert out.shape == (B, T, H)
    assert jnp.allclose(out, ref, atol=1e-4, rtol=1e-4), "mismatch vs reference"

    print("KERNEL_OK")
</pallas_src>

<mosaic_0001>
module attributes {stable_mosaic.version = 11 : i64} {
  func.func @_qkv_proj_kernel(%arg0: i32, %arg1: i32, %arg2: memref<1x8x32xf32, #tpu.memory_space<vmem>>, %arg3: memref<32x96xf32, #tpu.memory_space<vmem>>, %arg4: memref<1x96xf32, #tpu.memory_space<vmem>>, %arg5: memref<1x8x32xf32, #tpu.memory_space<vmem>>, %arg6: memref<1x8x32xf32, #tpu.memory_space<vmem>>, %arg7: memref<1x8x32xf32, #tpu.memory_space<vmem>>) attributes {dimension_semantics = [#tpu.dimension_semantics<parallel>, #tpu.dimension_semantics<parallel>], iteration_bounds = array<i64: 2, 1>, scalar_prefetch = 0 : i64, scratch_operands = 0 : i64, tpu.core_type = #tpu.core_type<tc>, window_params = [{transform_indices = @transform_0, window_bounds = array<i64: 1, 8, 32>}, {pipeline_mode = #tpu.pipeline_mode<synchronous>, transform_indices = @transform_1, window_bounds = array<i64: 32, 96>}, {pipeline_mode = #tpu.pipeline_mode<synchronous>, transform_indices = @transform_2, window_bounds = array<i64: 1, 96>}, {transform_indices = @transform_3, window_bounds = array<i64: 1, 8, 32>}, {transform_indices = @transform_4, window_bounds = array<i64: 1, 8, 32>}, {transform_indices = @transform_5, window_bounds = array<i64: 1, 8, 32>}]} {
    %c0 = arith.constant 0 : index
    %c0_0 = arith.constant 0 : index
    %c0_1 = arith.constant 0 : index
    %0 = vector.load %arg2[%c0, %c0_0, %c0_1] : memref<1x8x32xf32, #tpu.memory_space<vmem>>, vector<1x8x32xf32>
    %1 = vector.shape_cast %0 : vector<1x8x32xf32> to vector<8x32xf32>
    %c0_2 = arith.constant 0 : index
    %c0_3 = arith.constant 0 : index
    %2 = vector.load %arg3[%c0_2, %c0_3] : memref<32x96xf32, #tpu.memory_space<vmem>>, vector<32x96xf32>
    %cst = arith.constant dense<0.000000e+00> : vector<8x96xf32>
    %3 = tpu.matmul %1, %2, %cst {dimension_numbers = #tpu.dot_dimension_numbers<[1], [0], [0], [1], [0, 0, 1, 1], [], []>} : vector<8x32xf32>, vector<32x96xf32>, vector<8x96xf32> -> vector<8x96xf32>
    %c0_4 = arith.constant 0 : index
    %c0_5 = arith.constant 0 : index
    %4 = vector.load %arg4[%c0_4, %c0_5] : memref<1x96xf32, #tpu.memory_space<vmem>>, vector<1x96xf32>
    %5 = vector.broadcast %4 : vector<1x96xf32> to vector<8x96xf32>
    %6 = arith.addf %3, %5 : vector<8x96xf32>
    %7 = vector.extract_strided_slice %6 {offsets = [0, 0], sizes = [8, 32], strides = [1, 1]} : vector<8x96xf32> to vector<8x32xf32>
    %c0_6 = arith.constant 0 : index
    %c0_7 = arith.constant 0 : index
    %c0_8 = arith.constant 0 : index
    %8 = vector.load %arg5[%c0_6, %c0_7, %c0_8] : memref<1x8x32xf32, #tpu.memory_space<vmem>>, vector<1x8x32xf32>
    %9 = vector.shape_cast %8 : vector<1x8x32xf32> to vector<8x32xf32>
    %10 = vector.shape_cast %7 : vector<8x32xf32> to vector<1x8x32xf32>
    tpu.vector_store %arg5[%c0_6, %c0_7, %c0_8], %10 {strides = array<i32>} : memref<1x8x32xf32, #tpu.memory_space<vmem>>, vector<1x8x32xf32>,
    %11 = vector.extract_strided_slice %6 {offsets = [0, 32], sizes = [8, 32], strides = [1, 1]} : vector<8x96xf32> to vector<8x32xf32>
    %c0_9 = arith.constant 0 : index
    %c0_10 = arith.constant 0 : index
    %c0_11 = arith.constant 0 : index
    %12 = vector.load %arg6[%c0_9, %c0_10, %c0_11] : memref<1x8x32xf32, #tpu.memory_space<vmem>>, vector<1x8x32xf32>
    %13 = vector.shape_cast %12 : vector<1x8x32xf32> to vector<8x32xf32>
    %14 = vector.shape_cast %11 : vector<8x32xf32> to vector<1x8x32xf32>
    tpu.vector_store %arg6[%c0_9, %c0_10, %c0_11], %14 {strides = array<i32>} : memref<1x8x32xf32, #tpu.memory_space<vmem>>, vector<1x8x32xf32>,
    %15 = vector.extract_strided_slice %6 {offsets = [0, 64], sizes = [8, 32], strides = [1, 1]} : vector<8x96xf32> to vector<8x32xf32>
    %c0_12 = arith.constant 0 : index
    %c0_13 = arith.constant 0 : index
    %c0_14 = arith.constant 0 : index
    %16 = vector.load %arg7[%c0_12, %c0_13, %c0_14] : memref<1x8x32xf32, #tpu.memory_space<vmem>>, vector<1x8x32xf32>
    %17 = vector.shape_cast %16 : vector<1x8x32xf32> to vector<8x32xf32>
    %18 = vector.shape_cast %15 : vector<8x32xf32> to vector<1x8x32xf32>
    tpu.vector_store %arg7[%c0_12, %c0_13, %c0_14], %18 {strides = array<i32>} : memref<1x8x32xf32, #tpu.memory_space<vmem>>, vector<1x8x32xf32>,
    return
  }
  func.func @transform_0(%arg0: i32, %arg1: i32) -> (i32, i32, i32) {
    %c0_i32 = arith.constant 0 : i32
    %c0_i32_0 = arith.constant 0 : i32
    return %arg0, %arg1, %c0_i32 : i32, i32, i32
  }
  func.func @transform_1(%arg0: i32, %arg1: i32) -> (i32, i32) {
    %c0_i32 = arith.constant 0 : i32
    %c0_i32_0 = arith.constant 0 : i32
    %c0_i32_1 = arith.constant 0 : i32
    return %c0_i32, %c0_i32_0 : i32, i32
  }
  func.func @transform_2(%arg0: i32, %arg1: i32) -> (i32, i32) {
    %c0_i32 = arith.constant 0 : i32
    %c0_i32_0 = arith.constant 0 : i32
    %c0_i32_1 = arith.constant 0 : i32
    return %c0_i32, %c0_i32_0 : i32, i32
  }
  func.func @transform_3(%arg0: i32, %arg1: i32) -> (i32, i32, i32) {
    %c0_i32 = arith.constant 0 : i32
    %c0_i32_0 = arith.constant 0 : i32
    return %arg0, %arg1, %c0_i32 : i32, i32, i32
  }
  func.func @transform_4(%arg0: i32, %arg1: i32) -> (i32, i32, i32) {
    %c0_i32 = arith.constant 0 : i32
    %c0_i32_0 = arith.constant 0 : i32
    return %arg0, %arg1, %c0_i32 : i32, i32, i32
  }
  func.func @transform_5(%arg0: i32, %arg1: i32) -> (i32, i32, i32) {
    %c0_i32 = arith.constant 0 : i32
    %c0_i32_0 = arith.constant 0 : i32
    return %arg0, %arg1, %c0_i32 : i32, i32, i32
  }
}

</mosaic_0001>

<bundles_post_ra>
// kernel: tpu_custom_call.1
= control target key start
LH: loop header
LB: loop body
LE: loop exit
PB: predicated region body
PF: predicated region fallthrough
CT: control target
= control target key end

     0   :  { %11 = vsyncpa [#allocation3], 0  ;;  %s1375_s0 = inlined_call_operand.hbm [shape: f32[2,8,32], index: 0, kind: input, shape index: {}]   ;;  %s1376_s1 = inlined_call_operand.hbm [shape: f32[32,96], index: 1, kind: input, shape index: {}]   ;;  %s1377_s2 = inlined_call_operand.hbm [shape: f32[1,96], index: 2, kind: input, shape index: {}]   ;;  %s1378_s3 = inlined_call_operand.hbm [shape: f32[2,8,32], index: 3, kind: output, shape index: {0}]   ;;  %s1379_s4 = inlined_call_operand.hbm [shape: f32[2,8,32], index: 4, kind: output, shape index: {1}]   ;;  %s1380_s5 = inlined_call_operand.hbm [shape: f32[2,8,32], index: 5, kind: output, shape index: {2}]  }
   0x1   :  { %13 = vsyncpa [#allocation3 + $0x1], 0 }
   0x2   :  { %14 = vsyncpa [#allocation6], 0 }
   0x3   :  { %15 = vsyncpa [#allocation4], 0 }
   0x4   :  { %17 = vsyncpa [#allocation4 + $0x1], 0 }
   0x5   :  { %18 = vsyncpa [#allocation10], 0 }
   0x6   :  { %20 = vsyncpa [#allocation10 + $0x1], 0  ;;  %s1041_s18 = smov 0   ;;  %s1043_s19 = smov 0  }
   0x7   :  { %s1045_s20 = smov 0   ;;  %s1047_s21 = smov 0  }
   0x8   :  { %s1049_s22 = smov 0   ;;  %s1051_s23 = smov 0  }
   0x9 LB: > { %s1072_s24 = sadd.s32 4294967295, %s996_s23   ;;  %s618_s25 = sadd.s32 4294967294, %s996_s23   ;;  %s996_s23 = sphi %s1051_s23, %s26_s23   ;;  %s992_s22 = sphi %s1049_s22, %s1401_s22   ;;  %s988_s21 = sphi %s1047_s21, %s1400_s21   ;;  %s984_s20 = sphi %s1045_s20, %s1399_s20   ;;  %s980_s19 = sphi %s1043_s19, %s1398_s19   ;;  %s976_s18 = sphi %s1041_s18, %s1397_s18  }
   0xa   : > { %p60_p0 = scmp.ne.s32.totalorder %s980_s19, %s976_s18  ;;  %p1381_p1 = scmp.eq.s32.totalorder %s1072_s24, 0 }
   0xb   : > { %p134_p3 = scmp.eq.s32.totalorder %s618_s25, 1  ;;  %p619_p5 = scmp.ge.s32.totalorder %s996_s23, 1 }
   0xc   : > { %p1083_p4 = por %p1381_p1, %p60_p0  ;;  %p197_p7 = scmp.lt.s32.totalorder %s996_s23, 3 }
   0xd   : > { %p1088_p6 = por %p134_p3, %p60_p0  ;;  %s998_s29 = smov [#allocation5]  }
   0xe   : > { %s1384_s26 = scalar_select %p1083_p4, 1, 0 }
   0xf   : > { %s1385_s27 = scalar_select %p1088_p6, 1, 0 }
  0x10   : > { %p1093_p8 = pnand %p619_p5, %p197_p7  ;;  %s209_s30 = sshll.u32 %s998_s29, 4  ;;  %s1097_s30 = int_to_ptr.vmem [resolvable:$true] %s209_s30 }
  0x11   : > { %s999_s7 = smov [#allocation7]   ;;  %s764_s11 = scalar_lea.hbm %s1376_s1, 512 }
  0x12   : > { %p680_p9 = pneg %p1093_p8  ;;  %s223_s8 = sshll.u32 %s999_s7, 4  ;;  %s1108_s8 = int_to_ptr.vmem [resolvable:$true] %s223_s8 }
  0x13   : > { %p765_p12 = scmp.ne.s32.totalorder %s1376_s1, %s764_s11  ;;  %p771_p5 = scmp.lt.u32.totalorder %s764_s11, %s1376_s1 }
  0x14   : > { %p1104_p11 = pnand %p680_p9, %p1381_p1 }
  0x16   : > { %p766_p13 = pneg %p1104_p11 }
  0x18   : > { %p767_p0 = pnand %p766_p13, %p765_p12 }
  0x1a   : > { %p768_p3 = pneg %p767_p0 }
  0x1c   : > { %p773_p7 = pnand %p771_p5, %p768_p3 }
  0x1e   : > { %776 = shalt.err (!%p773_p7)
}
  0x1f   : > { %s777_s16 = scalar_lea.vmem %s1097_s30, 512  ;;  %p785_p2 = scmp.lt.s32.totalorder %s1097_s30, %s1097_s30 }
  0x20   : > { %p778_p9 = scmp.ne.s32.totalorder %s1097_s30, %s777_s16  ;;  %p786_p12 = scmp.lt.s32.totalorder %s777_s16, %s777_s16 }
  0x22   : > { %p780_p10 = pnand %p778_p9, %p766_p13  ;;  %p787_p0 = por %p786_p12, %p785_p2 }
  0x24   : > { %p781_p1 = pneg %p780_p10 }
  0x26   : > { %p788_p6 = pnand %p787_p0, %p781_p1 }
  0x28   : > { %791 = shalt.err (!%p788_p6)
}
  0x29   : > { %s1000_s17 = smov 128   ;;  %s1001_s29 = smov 8  }
  0x2a   : > { %683 = dma.hbm_to_vmem [thread:$0]  (!%p1104_p11), %s1376_s1, 512, %s1097_s30, [#allocation6], %s1000_s17, %s1000_s17, %s1001_s29  }
  0x2b   : > { %s792_s12 = scalar_lea.hbm %s1377_s2, 16 }
  0x2c   : > { %p793_p2 = scmp.ne.s32.totalorder %s1377_s2, %s792_s12  ;;  %p799_p10 = scmp.lt.u32.totalorder %s792_s12, %s1377_s2 }
  0x2e   : > { %p795_p1 = pnand %p793_p2, %p766_p13 }
  0x30   : > { %p796_p6 = pneg %p795_p1 }
  0x32   : > { %p801_p3 = pnand %p799_p10, %p796_p6 }
  0x34   : > { %804 = shalt.err (!%p801_p3)
}
  0x35   : > { %s805_s30 = scalar_lea.vmem %s1108_s8, 16  ;;  %s812_s17 = scalar_lea.vmem %s1108_s8, 32 }
  0x36   : > { %p806_p5 = scmp.ne.s32.totalorder %s1108_s8, %s805_s30  ;;  %p813_p12 = scmp.lt.s32.totalorder %s1108_s8, %s1108_s8 }
  0x37   : > { %p814_p0 = scmp.lt.s32.totalorder %s812_s17, %s805_s30 }
  0x38   : > { %p808_p7 = pnand %p806_p5, %p766_p13 }
  0x39   : > { %p815_p2 = por %p814_p0, %p813_p12 }
  0x3a   : > { %p809_p9 = pneg %p808_p7 }
  0x3c   : > { %p816_p1 = pnand %p815_p2, %p809_p9 }
  0x3e   : > { %819 = shalt.err (!%p816_p1)
}
  0x3f   : > { %686 = dma.hbm_to_vmem [thread:$0]  (!%p1104_p11), %s1377_s2, 16, %s1108_s8, [#allocation6]  }
  0x40   : > { %s38_s9 = sadd.s32 1, %s992_s22  ;;  %s47_s10 = sadd.s32 1, %s984_s20 }
  0x41   : > { %p40_p13 = scmp.ge.s32.totalorder %s38_s9, 2  ;;  %p54_p6 = scmp.ne.s32.totalorder %s984_s20, %s980_s19 }
  0x42   : > { %p55_p10 = scmp.eq.s32.totalorder %s996_s23, 0  ;;  %p703_p3 = scmp.lt.s32.totalorder %s996_s23, 2 }
  0x43   : > { %s1403_s9 = smov (%p40_p13, %s38_s9), 0  ;;  %p1388_p7 = scmp.eq.s32.totalorder %s1072_s24, 1 }
  0x44   : > { %p56_p5 = por %p55_p10, %p54_p6  ;;  %s42_s11 = ssub.s32 %s992_s22, %s1403_s9 }
  0x45   : > { %p1173_p9 = por %p1388_p7, %p54_p6  ;;  %s234_s12 = sand.u32 1, %s984_s20  }
  0x46   : > { %p45_p12 = scmp.eq.s32.totalorder %s42_s11, 0  ;;  %s623_s8 = sshll.u32 %s234_s12, 3 }
  0x47   : > { %s1389_s6 = scalar_select %p1173_p9, 1, 0 }
  0x48   : > { %s624_s13 = sshll.u32 %s992_s22, 7  ;;  %s238_s17 = scalar_lea.vmem [#allocation2], %s623_s8 }
  0x49   : > { %s1182_s14 = scalar_select %p45_p12, %s984_s20, %s47_s10  }
  0x4a   : > { %s1187_s30 = scalar_lea.hbm %s1375_s0, %s624_s13  ;;  %s246_s29 = sshll.u32 %s238_s17, 4  ;;  %s1195_s29 = int_to_ptr.vmem [resolvable:$true] %s246_s29 }
  0x4b   : > { %p1191_p11 = pnand %p703_p3, %p56_p5  ;;  %s235_s10 = scalar_lea.sflag [#allocation3], %s234_s12 }
  0x4c   : > { %s820_s11 = scalar_lea.hbm %s1187_s30, 128  ;;  %s825_s15 = scalar_lea.hbm %s1375_s0, 256 }
  0x4d   : > { %p821_p0 = scmp.ne.s32.totalorder %s1187_s30, %s820_s11  ;;  %p822_p2 = pneg %p1191_p11 }
  0x4e   : > { %p826_p6 = scmp.lt.u32.totalorder %s1187_s30, %s1375_s0  ;;  %p827_p10 = scmp.lt.u32.totalorder %s825_s15, %s820_s11 }
  0x4f   : > { %p823_p1 = pnand %p822_p2, %p821_p0  ;;  %p829_p5 = scmp.lt.u32.totalorder %s820_s11, %s1187_s30 }
  0x50   : > { %p828_p3 = por %p827_p10, %p826_p6 }
  0x51   : > { %p824_p13 = pneg %p823_p1 }
  0x52   : > { %p830_p7 = por %p829_p5, %p828_p3 }
  0x54   : > { %p831_p12 = pnand %p830_p7, %p824_p13 }
  0x56   : > { %834 = shalt.err (!%p831_p12)
}
  0x57   : > { %s835_s12 = scalar_lea.vmem %s1195_s29, 128  ;;  %s1002_s8 = smov [#allocation2]  }
  0x58   : > { %p836_p0 = scmp.ne.s32.totalorder %s1195_s29, %s835_s12  ;;  %s840_s13 = sshll.u32 %s1002_s8, 4  ;;  %s841_s13 = int_to_ptr.vmem [resolvable:$false] %s840_s13 }
  0x59   : > { %s842_s16 = scalar_lea.vmem %s841_s13, 256  ;;  %p843_p4 = scmp.lt.s32.totalorder %s1195_s29, %s841_s13 }
  0x5a   : > { %p838_p1 = pnand %p836_p0, %p822_p2  ;;  %p844_p6 = scmp.lt.s32.totalorder %s842_s16, %s835_s12 }
  0x5c   : > { %p839_p9 = pneg %p838_p1  ;;  %p845_p10 = por %p844_p6, %p843_p4 }
  0x5e   : > { %p846_p3 = pnand %p845_p10, %p839_p9 }
  0x60   : > { %849 = shalt.err (!%p846_p3)
}
  0x61   : > { %690 = dma.hbm_to_vmem [thread:$0]  (!%p1191_p11), %s1187_s30, 128, %s1195_s29, %s235_s10  }
  0x62   : > { %255 = sbr.rel (%p1093_p8) target bundleno = 485 (0x1e5), region = 32  ;;  %s1225_s11 = sand.u32 (!%p1093_p8), 1, %s980_s19  }
  0x63   : > { %s1228_s15 = sshll.u32 (!%p1093_p8), %s1225_s11, 3  ;;  %s258_s17 = scalar_lea.sflag (!%p1093_p8), [#allocation3], %s1225_s11 }
  0x64   : > { %s261_s12 = scalar_lea.vmem (!%p1093_p8), [#allocation2], %s1228_s15  ;;  %p1391_p4 = scmp.ne.s32.totalorder (!%p1093_p8), %s1384_s26, 0 }
  0x69   : > { %959 = dma.done.wait (%p1391_p4), %s258_s17, 128  }
  0x6a   : > { %961 = vsyncadd (%p1391_p4), %s258_s17, 4294967168  ;;  %p1392_p9 = scmp.eq.s32.totalorder %s1072_s24, 0 }
  0x6c   : > { %963 = dma.done.wait (%p1392_p9), [#allocation6], 528   ;;  %p1393_p8 = pmov %p1392_p9 }
  0x6d   : > { %v1003_v0 = vmov 0.0|0.0   ;;  %vm1004_vm0 = vmmov 0   ;;  %v1005_v1 = vmov 0.0   ;;  %v307_v2 = vld [vmem:[#allocation5] sm:$0xff]  ;;  %v308_v3 = vld [vmem:[#allocation5 + $0x8] sm:$0xff]  ;;  %v309_v4 = vld [vmem:[#allocation5 + $0x10] sm:$0xff] }
  0x6e   : > { %965 = vsyncadd (%p1393_p8), [#allocation6], 4294966768  ;;  %658 = vmatprep.subr.bf16.mxu0 %v1003_v0  ;;  %655 = vmatprep.mubr.msk.f32.mxu0 %vm1004_vm0, %v1005_v1  ;;  %v659_v5 = vpack.c.bf16 %v308_v3, %v307_v2  ;;  %v310_v6 = vld [vmem:[#allocation5 + $0x18] sm:$0xff]  ;;  %vm318_vm1 = vcmask 261120   ;;  %v632_v9 = vld [vmem:[#allocation7] ss:$0 sm:$0xff] }
  0x6f   : > { %v662_v7 = vpack.c.bf16 %v310_v6, %v309_v4  ;;  %v306_v8 = vld [vmem:[%s261_s12] sm:$0xff]  ;;  %s1242_s26 = sshll.u32 %s988_s21, 7  ;;  %s291_s28 = scalar_lea.vmem [#allocation8], %s1228_s15 }
  0x70   : > { %660 = vmatpush3.bf16.msra.mxu0 %v659_v5  ;;  %s427_s30 = sshll.u32 %s291_s28, 4  ;;  %s1249_s10 = scalar_lea.hbm %s1378_s3, %s1242_s26  ;;  %s1251_s30 = int_to_ptr.vmem [resolvable:$true] %s427_s30 }
  0x71   : > { %661 = vmatprep.subr.bf16.mxu0 %v1003_v0  ;;  %s1006_s8 = smov 96   ;;  %s403_s21 = scalar_lea.sflag [#allocation4], %s1225_s11 }
  0x72   : > { %s850_s13 = scalar_lea.vmem %s1251_s30, 128  ;;  %p1394_p2 = scmp.ne.s32.totalorder %s1389_s6, 0 }
  0x73   : > { %p851_p11 = scmp.ne.s32.totalorder %s1251_s30, %s850_s13  ;;  %s1007_s16 = smov [#allocation8]  }
  0x74   : > { %663 = vmatpush3.bf16.msra.mxu0 %v662_v7  ;;  %s854_s17 = sshll.u32 %s1007_s16, 4  ;;  %s855_s17 = int_to_ptr.vmem [resolvable:$false] %s854_s17 }
  0x75   : > { %p852_p13 = pnand %p851_p11, %p1394_p2  ;;  %s856_s12 = scalar_lea.vmem %s855_s17, 256 }
  0x76   : > { %p857_p7 = scmp.lt.s32.totalorder %s1251_s30, %s855_s17  ;;  %p858_p12 = scmp.lt.s32.totalorder %s856_s12, %s850_s13 }
  0x77   : > { %656 = vmatmul.mubr.msk.f32.vlgmr.msra.gmra.mrb[0].mxu0 %vm318_vm1, %v306_v8  ;;  %p853_p5 = pneg %p852_p13 }
  0x78   : > { %p859_p0 = por %p858_p12, %p857_p7 }
  0x7a   : > { %p860_p1 = pnand %p859_p0, %p853_p5 }
 0x14a   : > { %v388_v10 = vpop.f32.mrb[0].mxu0 }
 0x14b   : > { %v389_v11 = vadd.f32 %v632_v9, %v388_v10  ;;  %v657_v12 = vpop.f32.mrb[1].mxu0 }
 0x14d   : > { %394 = vrot.lane.b32.xlu0 %v389_v11, %s1006_s8  ;;  %392 = vst.msk [vmem:[%s291_s28] sm:$0xff] %vm318_vm1, %v389_v11 }
 0x14e   : > { %863 = shalt.err (!%p860_p1)
}
 0x14f   : > { %s864_s11 = scalar_lea.hbm %s1249_s10, 128  ;;  %s868_s7 = scalar_lea.hbm %s1378_s3, 256 }
 0x150   : > { %p865_p6 = scmp.ne.s32.totalorder %s1249_s10, %s864_s11  ;;  %p869_p4 = scmp.lt.u32.totalorder %s1249_s10, %s1378_s3 }
 0x151   : > { %p870_p9 = scmp.lt.u32.totalorder %s868_s7, %s864_s11  ;;  %p872_p11 = scmp.lt.u32.totalorder %s864_s11, %s1249_s10 }
 0x152   : > { %p866_p10 = pnand %p865_p6, %p1394_p2 }
 0x153   : > { %p871_p8 = por %p870_p9, %p869_p4 }
 0x154   : > { %p867_p3 = pneg %p866_p10 }
 0x155   : > { %p873_p13 = por %p872_p11, %p871_p8 }
 0x157   : > { %p874_p5 = pnand %p873_p13, %p867_p3 }
 0x159   : > { %877 = shalt.err (!%p874_p5)
}
 0x15a   : > { %674 = dma.vmem_to_hbm [thread:$0]  (%p1394_p2), %s1251_s30, 128, %s1249_s10, %s403_s21  }
 0x15b   : > { %s1008_s13 = smov 64   ;;  %s407_s17 = sand.u32 1, %s1072_s24  }
 0x15c   : > { %398 = vrot.lane.b32.xlu0 %v389_v11, %s1008_s13  ;;  %s298_s12 = scalar_lea.vmem [#allocation9], %s1228_s15  ;;  %s1282_s7 = scalar_lea.hbm %s1379_s4, %s1242_s26 }
 0x15d   : > { %s441_s28 = sshll.u32 %s298_s12, 4  ;;  %s305_s8 = scalar_lea.vmem [#allocation11], %s1228_s15  ;;  %s1284_s28 = int_to_ptr.vmem [resolvable:$true] %s441_s28 }
 0x15e   : > { %s1289_s16 = sshll.u32 %s305_s8, 4  ;;  %s1292_s24 = scalar_lea.sflag [#allocation10], %s407_s17  ;;  %s1323_s16 = int_to_ptr.vmem [resolvable:$true] %s1289_s16 }
 0x15f   : > { %s878_s30 = scalar_lea.vmem %s1284_s28, 128  ;;  %s1009_s10 = smov [#allocation9]  }
 0x160   : > { %p879_p7 = scmp.ne.s32.totalorder %s1284_s28, %s878_s30  ;;  %s882_s21 = sshll.u32 %s1009_s10, 4  ;;  %s883_s21 = int_to_ptr.vmem [resolvable:$false] %s882_s21 }
 0x161   : > { %s884_s13 = scalar_lea.vmem %s883_s21, 256  ;;  %p885_p1 = scmp.lt.s32.totalorder %s1284_s28, %s883_s21 }
 0x162   : > { %p880_p12 = pnand %p879_p7, %p1394_p2  ;;  %p886_p6 = scmp.lt.s32.totalorder %s884_s13, %s878_s30 }
 0x164   : > { %p881_p0 = pneg %p880_p12  ;;  %p887_p10 = por %p886_p6, %p885_p1 }
 0x166   : > { %p888_p3 = pnand %p887_p10, %p881_p0 }
 0x1bf   : > { %v395_v13 = vpop.permute.xlu0 %394 }
 0x1c0   : > { %397 = vst.msk [vmem:[%s298_s12] sm:$0xff] %vm318_vm1, %v395_v13 }
 0x1c1   : > { %891 = shalt.err (!%p888_p3)
}
 0x1c2   : > { %s892_s17 = scalar_lea.hbm %s1282_s7, 128  ;;  %s896_s29 = scalar_lea.hbm %s1379_s4, 256 }
 0x1c3   : > { %p893_p4 = scmp.ne.s32.totalorder %s1282_s7, %s892_s17  ;;  %p897_p11 = scmp.lt.u32.totalorder %s1282_s7, %s1379_s4 }
 0x1c4   : > { %p898_p13 = scmp.lt.u32.totalorder %s896_s29, %s892_s17  ;;  %p900_p7 = scmp.lt.u32.totalorder %s892_s17, %s1282_s7 }
 0x1c5   : > { %p894_p9 = pnand %p893_p4, %p1394_p2 }
 0x1c6   : > { %p899_p5 = por %p898_p13, %p897_p11 }
 0x1c7   : > { %p895_p8 = pneg %p894_p9 }
 0x1c8   : > { %p901_p12 = por %p900_p7, %p899_p5 }
 0x1ca   : > { %p902_p0 = pnand %p901_p12, %p895_p8 }
 0x1cc   : > { %905 = shalt.err (!%p902_p0)
}
 0x1cd   : > { %675 = dma.vmem_to_hbm [thread:$0]  (%p1394_p2), %s1284_s28, 128, %s1282_s7, %s1292_s24  }
 0x1ce   : > { %s1320_s12 = scalar_lea.hbm %s1380_s5, %s1242_s26  ;;  %v399_v14 = vpop.permute.xlu0 %398  ;;  %s906_s17 = scalar_lea.vmem %s1323_s16, 128 }
 0x1cf   : > { %401 = vst.msk [vmem:[%s305_s8] sm:$0xff] %vm318_vm1, %v399_v14  ;;  %p907_p1 = scmp.ne.s32.totalorder %s1323_s16, %s906_s17  ;;  %s1010_s28 = smov [#allocation11]  }
 0x1d0   : > { %s910_s7 = sshll.u32 %s1010_s28, 4  ;;  %s911_s7 = int_to_ptr.vmem [resolvable:$false] %s910_s7 }
 0x1d1   : > { %p908_p6 = pnand %p907_p1, %p1394_p2  ;;  %s912_s11 = scalar_lea.vmem %s911_s7, 256 }
 0x1d2   : > { %p913_p3 = scmp.lt.s32.totalorder %s1323_s16, %s911_s7  ;;  %p914_p4 = scmp.lt.s32.totalorder %s912_s11, %s906_s17 }
 0x1d3   : > { %p909_p10 = pneg %p908_p6 }
 0x1d4   : > { %p915_p9 = por %p914_p4, %p913_p3 }
 0x1d6   : > { %p916_p8 = pnand %p915_p9, %p909_p10 }
 0x1d8   : > { %919 = shalt.err (!%p916_p8)
}
 0x1d9   : > { %s920_s15 = scalar_lea.hbm %s1320_s12, 128  ;;  %s924_s29 = scalar_lea.hbm %s1380_s5, 256 }
 0x1da   : > { %p921_p11 = scmp.ne.s32.totalorder %s1320_s12, %s920_s15  ;;  %p925_p7 = scmp.lt.u32.totalorder %s1320_s12, %s1380_s5 }
 0x1db   : > { %p926_p12 = scmp.lt.u32.totalorder %s924_s29, %s920_s15  ;;  %p928_p1 = scmp.lt.u32.totalorder %s920_s15, %s1320_s12 }
 0x1dc   : > { %p922_p13 = pnand %p921_p11, %p1394_p2 }
 0x1dd   : > { %p927_p0 = por %p926_p12, %p925_p7 }
 0x1de   : > { %p923_p5 = pneg %p922_p13 }
 0x1df   : > { %p929_p6 = por %p928_p1, %p927_p0 }
 0x1e1   : > { %p930_p10 = pnand %p929_p6, %p923_p5 }
 0x1e3   : > { %933 = shalt.err (!%p930_p10)
}
 0x1e4   : > { %676 = dma.vmem_to_hbm [thread:$0]  (%p1394_p2), %s1323_s16, 128, %s1320_s12, %s1292_s24  }
 0x1e5 PF: > { %s467_s30 = sand.u32 1, %s976_s18   ;;  %p1395_p3 = scmp.ne.s32.totalorder %s1385_s27, 0 }
 0x1e6   : > { %p1396_p4 = scmp.ge.s32.totalorder %s996_s23, 2  ;;  %s468_s13 = scalar_lea.sflag [#allocation4], %s467_s30 }
 0x1e8   : > { %p692_p9 = pnand %p1396_p4, %p1395_p3 }
 0x1ea   : > { %967 = dma.done.wait (!%p692_p9), %s468_s13, 128  }
 0x1eb   : > { %969 = vsyncadd (!%p692_p9), %s468_s13, 4294967168  ;;  %s476_s17 = sand.u32 1, %s618_s25  }
 0x1ec   : > { %s477_s28 = scalar_lea.sflag [#allocation10], %s476_s17 }
 0x1ed   : > { %971 = dma.done.wait (!%p692_p9), %s477_s28, 256  }
 0x1ee   : > { %973 = vsyncadd (!%p692_p9), %s477_s28, 4294967040  ;;  %s26_s23 = sadd.s32 1, %s996_s23   ;;  %s1397_s18 = smov %s980_s19 }
 0x1ef   : > { %p23_p2 = scmp.ge.s32.totalorder %s26_s23, 4   ;;  %s1398_s19 = smov %s984_s20 }
 0x1f0   : > { %s1399_s20 = smov %s1182_s14  ;;  %s1400_s21 = smov %s992_s22 }
 0x1f1   : > { %s1401_s22 = smov %s1403_s9  ;;  %25 = sbr.rel (!%p23_p2) target bundleno = 9 (0x9), region = 117 }
 0x1f8   :  { %491 = vsyncpa [#allocation3], 1 }
 0x1f9   :  { %493 = vsyncpa [#allocation3 + $0x1], 1 }
 0x1fa   :  { %494 = vsyncpa [#allocation6], 1 }
 0x1fb   :  { %495 = vsyncpa [#allocation4], 1 }
 0x1fc   :  { %497 = vsyncpa [#allocation4 + $0x1], 1 }
 0x1fd   :  { %498 = vsyncpa [#allocation10], 1 }
 0x1fe   :  { %500 = vsyncpa [#allocation10 + $0x1], 1 }

</bundles_post_ra>
